<compile_context>
chip_gen: v6e
topology: v6e:2x2x1
jax: 0.10.0
libtpu: 0.0.40
codegen_flags: <defaults>
</compile_context>

<pallas_src>
import functools

import jax
import jax.numpy as jnp
from jax.experimental import pallas as pl
from jax.experimental.pallas import tpu as pltpu


def _triplet_kernel(a_ref, p_ref, n_ref, out_ref, acc_ref, *,
                    margin, batch, tile, mask_start):
    """mask_start: first *unclamped* tile index that needs row masking,
    or None if no tile needs masking (trace-time lean path)."""
    i = pl.program_id(1)          # reduction axis over batch tiles
    spc = pl.num_programs(1)      # steps per core

    @pl.when(i == 0)
    def _init():
        acc_ref[...] = jnp.zeros_like(acc_ref)

    a = a_ref[...].astype(jnp.float32)
    p = p_ref[...].astype(jnp.float32)
    n = n_ref[...].astype(jnp.float32)

    dp = a - p
    dn = a - n
    # Fused: (a-p)^2 - (a-n)^2 summed once over the embedding (lane) axis.
    d = dp * dp - dn * dn
    row = jnp.sum(d, axis=1, keepdims=True)                    # [tile, 1]
    per_row = jnp.maximum(row + jnp.float32(margin), 0.0)      # relu(pd-nd+margin)

    if mask_start is None:
        # Batch divides evenly and there are no clamped duplicate tiles.
        acc_ref[...] += per_row
    else:
        c = pl.program_id(0)
        t_raw = c * spc + i       # unclamped tile index

        @pl.when(t_raw < mask_start)
        def _plain():
            acc_ref[...] += per_row

        @pl.when(t_raw >= mask_start)
        def _masked():
            # Remainder tile (partial mask) or clamped duplicate tile (all-zero).
            rid = t_raw * tile + jax.lax.broadcasted_iota(
                jnp.int32, per_row.shape, 0)
            acc_ref[...] += jnp.where(rid < batch, per_row, 0.0)

    @pl.when(i == spc - 1)
    def _finalize():
        total = jnp.sum(acc_ref[...])
        r = jax.lax.broadcasted_iota(jnp.int32, (8, 128), 0)
        l = jax.lax.broadcasted_iota(jnp.int32, (8, 128), 1)
        # Per-core partial sum stored at [0, 0] of this core's (8, 128) block;
        # the whole block is written so no garbage lanes leak to the wrapper.
        out_ref[...] = jnp.where((r == 0) & (l == 0), total, 0.0)


def _chip_config():
    kind = ""
    try:
        kind = str(jax.devices()[0].device_kind).lower()
    except Exception:
        pass
    is_v7 = ("v7" in kind) or ("7x" in kind)
    is_v6 = "v6" in kind
    is_v5 = "v5" in kind

    vmem_phys = None
    try:
        vmem_phys = int(pltpu.get_tpu_info().vmem_capacity_bytes)
    except Exception:
        vmem_phys = None
    if not vmem_phys or vmem_phys < 32 * 1024 * 1024:
        vmem_phys = (64 if is_v7 else 128) * 1024 * 1024

    if is_v7:
        batch_tile, num_cores = 2048, 2     # 24 MiB inputs, fits 64 MiB VMEM
    elif is_v6 or is_v5:
        batch_tile, num_cores = 4096, 1     # 48 MiB inputs, fits 128 MiB VMEM
    else:
        batch_tile, num_cores = 1024, 1     # conservative default
    return dict(is_v7=is_v7, vmem_phys=vmem_phys,
                batch_tile=batch_tile, num_cores=num_cores)


def _launch(anchor, pos, neg, *, B, E, tb, margin, ncores, core_parallel,
            vmem_limit):
    num_tiles = pl.cdiv(B, tb)
    ncores = max(1, min(int(ncores), num_tiles))
    spc = pl.cdiv(num_tiles, ncores)
    last_tile = num_tiles - 1
    needs_clamp = ncores * spc > num_tiles        # static
    rem = (B % tb) != 0                           # static

    if rem:
        mask_start = last_tile        # last real tile + any clamped duplicates
    elif needs_clamp:
        mask_start = num_tiles        # only clamped duplicate tiles
    else:
        mask_start = None             # lean path everywhere

    def in_index(c, i):
        t = c * spc + i
        if needs_clamp:
            t = jnp.minimum(t, last_tile)
        return (t, 0)

    in_spec = pl.BlockSpec((tb, E), in_index)
    out_spec = pl.BlockSpec((8, 128), lambda c, i: (c, 0))

    kernel = functools.partial(_triplet_kernel, margin=float(margin),
                               batch=B, tile=tb, mask_start=mask_start)

    if ncores > 1 and core_parallel:
        dim_sems = (pltpu.CORE_PARALLEL, pltpu.ARBITRARY)   # v7x: 2 TensorCores
    else:
        dim_sems = ("arbitrary", "arbitrary")

    return pl.pallas_call(
        kernel,
        out_shape=jax.ShapeDtypeStruct((ncores * 8, 128), jnp.float32),
        grid_spec=pltpu.PrefetchScalarGridSpec(
            num_scalar_prefetch=0,
            grid=(ncores, spc),
            in_specs=[in_spec, in_spec, in_spec],
            out_specs=out_spec,
            scratch_shapes=[pltpu.VMEM((tb, 1), jnp.float32)],
        ),
        compiler_params=pltpu.CompilerParams(
            dimension_semantics=dim_sems,
            vmem_limit_bytes=int(vmem_limit),
        ),
    )(anchor, pos, neg)


def triplet_loss(anchor, pos, neg, *, emb_size=512, margin=2.0, average=True,
                 batch_tile=None, num_cores=None):
    # Glue: mimic torch .view([-1, emb_size]); dtype passes through (bf16 ok).
    anchor = anchor.reshape(-1, emb_size)
    pos = pos.reshape(-1, emb_size)
    neg = neg.reshape(-1, emb_size)
    B, E = anchor.shape

    cfg = _chip_config()
    if batch_tile is None:
        batch_tile = cfg["batch_tile"]
    if num_cores is None:
        num_cores = cfg["num_cores"]

    itemsize = max(jnp.dtype(anchor.dtype).itemsize,
                   jnp.dtype(pos.dtype).itemsize,
                   jnp.dtype(neg.dtype).itemsize)
    # Sublane packing granularity: 16 rows for 16-bit inputs, 8 for 32-bit.
    row_quant = 16 if itemsize == 2 else 8
    batch_tile = max(row_quant, (int(batch_tile) // row_quant) * row_quant)
    tb = B if B <= batch_tile else batch_tile

    # VMEM budget from actual footprint (double-buffered inputs + padded
    # scratch + output blocks + slack), clamped to physical VMEM.
    in_bytes = 2 * 3 * tb * E * itemsize          # 2 pipeline buffers x 3 inputs
    scratch_bytes = tb * 128 * 4                  # (tb,1) f32 acc pads lanes->128
    out_bytes = 2 * max(1, int(num_cores)) * 8 * 128 * 4
    vmem_limit = in_bytes + scratch_bytes + out_bytes + 4 * 1024 * 1024
    vmem_limit = max(vmem_limit, 16 * 1024 * 1024)
    vmem_limit = min(vmem_limit, cfg["vmem_phys"] - 4 * 1024 * 1024)

    common = dict(B=B, E=E, tb=tb, margin=margin, vmem_limit=vmem_limit)
    try:
        out = _launch(anchor, pos, neg, ncores=int(num_cores),
                      core_parallel=cfg["is_v7"], **common)
    except Exception:
        # Safe fallback: single sequential reduction axis, no core split.
        out = _launch(anchor, pos, neg, ncores=1, core_parallel=False, **common)

    scale = (1.0 / B) if average else 1.0
    return jnp.sum(out) * jnp.float32(scale)


def _reference(anchor, pos, neg, emb_size, margin, average):
    anchor = anchor.reshape(-1, emb_size).astype(jnp.float32)
    pos = pos.reshape(-1, emb_size).astype(jnp.float32)
    neg = neg.reshape(-1, emb_size).astype(jnp.float32)
    pd = jnp.sum((anchor - pos) ** 2, axis=1)
    nd = jnp.sum((anchor - neg) ** 2, axis=1)
    r = jax.nn.relu(pd - nd + margin)
    return r.mean() if average else r.sum()


if __name__ == "__main__":
    emb_size = 512
    margin = 2.0
    key = jax.random.PRNGKey(0)

    # Case 1: small batch, single full-array tile (module defaults).
    B = 8
    ka, kp, kn = jax.random.split(key, 3)
    anchor = jax.random.normal(ka, (B, emb_size), dtype=jnp.float32)
    pos = jax.random.normal(kp, (B, emb_size), dtype=jnp.float32)
    neg = jax.random.normal(kn, (B, emb_size), dtype=jnp.float32)

    out = jax.block_until_ready(
        triplet_loss(anchor, pos, neg, emb_size=emb_size, margin=margin,
                     average=True))
    ref = _reference(anchor, pos, neg, emb_size, margin, True)
    assert jnp.allclose(out, ref, rtol=1e-4, atol=1e-4), (out, ref)

    out_sum = jax.block_until_ready(
        triplet_loss(anchor, pos, neg, emb_size=emb_size, margin=margin,
                     average=False))
    ref_sum = _reference(anchor, pos, neg, emb_size, margin, False)
    assert jnp.allclose(out_sum, ref_sum, rtol=1e-4, atol=1e-4), (out_sum, ref_sum)

    # Case 2: non-divisible batch, multi-tile; exercises the remainder mask,
    # the interior lean path, and (on v7x) the 2-way core split with clamping.
    B2 = 20
    k2 = jax.random.split(key, 4)[3]
    ka2, kp2, kn2 = jax.random.split(k2, 3)
    anchor2 = jax.random.normal(ka2, (B2, emb_size), dtype=jnp.float32)
    pos2 = jax.random.normal(kp2, (B2, emb_size), dtype=jnp.float32)
    neg2 = jax.random.normal(kn2, (B2, emb_size), dtype=jnp.float32)

    out2 = jax.block_until_ready(
        triplet_loss(anchor2, pos2, neg2, emb_size=emb_size, margin=margin,
                     average=True, batch_tile=8))
    ref2 = _reference(anchor2, pos2, neg2, emb_size, margin, True)
    assert jnp.allclose(out2, ref2, rtol=1e-4, atol=1e-4), (out2, ref2)

    # Case 3: bf16 embeddings pass through unconverted (halves HBM traffic);
    # the kernel upcasts per tile and accumulates in f32.
    B3 = 16
    k3a, k3p, k3n = jax.random.split(jax.random.PRNGKey(1), 3)
    anchor3 = jax.random.normal(k3a, (B3, emb_size), dtype=jnp.bfloat16)
    pos3 = jax.random.normal(k3p, (B3, emb_size), dtype=jnp.bfloat16)
    neg3 = jax.random.normal(k3n, (B3, emb_size), dtype=jnp.bfloat16)

    out3 = jax.block_until_ready(
        triplet_loss(anchor3, pos3, neg3, emb_size=emb_size, margin=margin,
                     average=True))
    ref3 = _reference(anchor3, pos3, neg3, emb_size, margin, True)
    assert jnp.allclose(out3, ref3, rtol=1e-3, atol=1e-3), (out3, ref3)

    print("KERNEL_OK")
</pallas_src>

<mosaic_0001>
module attributes {stable_mosaic.version = 11 : i64} {
  func.func @_triplet_kernel(%arg0: i32, %arg1: i32, %arg2: memref<8x512xf32, #tpu.memory_space<vmem>>, %arg3: memref<8x512xf32, #tpu.memory_space<vmem>>, %arg4: memref<8x512xf32, #tpu.memory_space<vmem>>, %arg5: memref<8x128xf32, #tpu.memory_space<vmem>>, %arg6: memref<8x1xf32, #tpu.memory_space<vmem>>) attributes {dimension_semantics = [#tpu.dimension_semantics<arbitrary>, #tpu.dimension_semantics<arbitrary>], iteration_bounds = array<i64: 1, 1>, scalar_prefetch = 0 : i64, scratch_operands = 1 : i64, tpu.core_type = #tpu.core_type<tc>, window_params = [{transform_indices = @transform_0, window_bounds = array<i64: 8, 512>}, {transform_indices = @transform_1, window_bounds = array<i64: 8, 512>}, {transform_indices = @transform_2, window_bounds = array<i64: 8, 512>}, {transform_indices = @transform_3, window_bounds = array<i64: 8, 128>}]} {
    %c0_i32 = arith.constant 0 : i32
    %0 = arith.cmpi eq, %arg1, %c0_i32 : i32
    %1 = arith.extui %0 : i1 to i32
    %c0_i32_0 = arith.constant 0 : i32
    %2 = arith.cmpi ne, %1, %c0_i32_0 : i32
    scf.if %2 {
      %cst_14 = arith.constant 0.000000e+00 : f32
      %23 = vector.broadcast %cst_14 : f32 to vector<8x1xf32>
      %c0_15 = arith.constant 0 : index
      %c0_16 = arith.constant 0 : index
      %24 = vector.load %arg6[%c0_15, %c0_16] : memref<8x1xf32, #tpu.memory_space<vmem>>, vector<8x1xf32>
      tpu.vector_store %arg6[%c0_15, %c0_16], %23 {strides = array<i32>} : memref<8x1xf32, #tpu.memory_space<vmem>>, vector<8x1xf32>,
    } else {
    }
    %c0 = arith.constant 0 : index
    %c0_1 = arith.constant 0 : index
    %3 = vector.load %arg2[%c0, %c0_1] : memref<8x512xf32, #tpu.memory_space<vmem>>, vector<8x512xf32>
    %c0_2 = arith.constant 0 : index
    %c0_3 = arith.constant 0 : index
    %4 = vector.load %arg3[%c0_2, %c0_3] : memref<8x512xf32, #tpu.memory_space<vmem>>, vector<8x512xf32>
    %c0_4 = arith.constant 0 : index
    %c0_5 = arith.constant 0 : index
    %5 = vector.load %arg4[%c0_4, %c0_5] : memref<8x512xf32, #tpu.memory_space<vmem>>, vector<8x512xf32>
    %6 = arith.subf %3, %4 : vector<8x512xf32>
    %7 = arith.subf %3, %5 : vector<8x512xf32>
    %8 = arith.mulf %6, %6 : vector<8x512xf32>
    %9 = arith.mulf %7, %7 : vector<8x512xf32>
    %10 = arith.subf %8, %9 : vector<8x512xf32>
    %cst = arith.constant dense<0.000000e+00> : vector<8xf32>
    %11 = vector.multi_reduction <add>, %10, %cst [1] : vector<8x512xf32> to vector<8xf32>
    %12 = vector.shape_cast %11 : vector<8xf32> to vector<8x1xf32>
    %cst_6 = arith.constant 2.000000e+00 : f32
    %13 = vector.broadcast %cst_6 : f32 to vector<8x1xf32>
    %14 = arith.addf %12, %13 : vector<8x1xf32>
    %cst_7 = arith.constant 0.000000e+00 : f32
    %15 = vector.broadcast %cst_7 : f32 to vector<8x1xf32>
    %16 = arith.maximumf %14, %15 : vector<8x1xf32>
    %c0_8 = arith.constant 0 : index
    %c0_9 = arith.constant 0 : index
    %17 = vector.load %arg6[%c0_8, %c0_9] : memref<8x1xf32, #tpu.memory_space<vmem>>, vector<8x1xf32>
    %18 = arith.addf %17, %16 : vector<8x1xf32>
    %c0_10 = arith.constant 0 : index
    %c0_11 = arith.constant 0 : index
    %19 = vector.load %arg6[%c0_10, %c0_11] : memref<8x1xf32, #tpu.memory_space<vmem>>, vector<8x1xf32>
    tpu.vector_store %arg6[%c0_10, %c0_11], %18 {strides = array<i32>} : memref<8x1xf32, #tpu.memory_space<vmem>>, vector<8x1xf32>,
    %c0_i32_12 = arith.constant 0 : i32
    %20 = arith.cmpi eq, %arg1, %c0_i32_12 : i32
    %21 = arith.extui %20 : i1 to i32
    %c0_i32_13 = arith.constant 0 : i32
    %22 = arith.cmpi ne, %21, %c0_i32_13 : i32
    scf.if %22 {
      %c0_14 = arith.constant 0 : index
      %c0_15 = arith.constant 0 : index
      %23 = vector.load %arg6[%c0_14, %c0_15] : memref<8x1xf32, #tpu.memory_space<vmem>>, vector<8x1xf32>
      %24 = vector.shape_cast %23 : vector<8x1xf32> to vector<1x8x1xf32>
      %cst_16 = arith.constant dense<0.000000e+00> : vector<1xf32>
      %25 = vector.multi_reduction <add>, %24, %cst_16 [1, 2] : vector<1x8x1xf32> to vector<1xf32>
      %26 = vector.shape_cast %25 : vector<1xf32> to vector<1x1x1xf32>
      %27 = vector.extract %26[0, 0, 0] : f32 from vector<1x1x1xf32>
      %28 = tpu.iota {dimensions = array<i32: 0>} : vector<8x128xi32>
      %29 = tpu.iota {dimensions = array<i32: 1>} : vector<8x128xi32>
      %c0_i32_17 = arith.constant 0 : i32
      %30 = vector.broadcast %c0_i32_17 : i32 to vector<8x128xi32>
      %31 = arith.cmpi eq, %28, %30 : vector<8x128xi32>
      %c0_i32_18 = arith.constant 0 : i32
      %32 = vector.broadcast %c0_i32_18 : i32 to vector<8x128xi32>
      %33 = arith.cmpi eq, %29, %32 : vector<8x128xi32>
      %34 = arith.andi %31, %33 : vector<8x128xi1>
      %cst_19 = arith.constant 0.000000e+00 : f32
      %35 = vector.broadcast %27 : f32 to vector<8x128xf32>
      %36 = vector.broadcast %cst_19 : f32 to vector<8x128xf32>
      %37 = arith.select %34, %35, %36 : vector<8x128xi1>, vector<8x128xf32>
      %c0_20 = arith.constant 0 : index
      %c0_21 = arith.constant 0 : index
      %38 = vector.load %arg5[%c0_20, %c0_21] : memref<8x128xf32, #tpu.memory_space<vmem>>, vector<8x128xf32>
      tpu.vector_store %arg5[%c0_20, %c0_21], %37 {strides = array<i32>} : memref<8x128xf32, #tpu.memory_space<vmem>>, vector<8x128xf32>,
    } else {
    }
    return
  }
  func.func @transform_0(%arg0: i32, %arg1: i32) -> (i32, i32) {
    %c1_i32 = arith.constant 1 : i32
    %0 = arith.muli %arg0, %c1_i32 : i32
    %1 = arith.addi %0, %arg1 : i32
    %c0_i32 = arith.constant 0 : i32
    %c0_i32_0 = arith.constant 0 : i32
    return %1, %c0_i32 : i32, i32
  }
  func.func @transform_1(%arg0: i32, %arg1: i32) -> (i32, i32) {
    %c1_i32 = arith.constant 1 : i32
    %0 = arith.muli %arg0, %c1_i32 : i32
    %1 = arith.addi %0, %arg1 : i32
    %c0_i32 = arith.constant 0 : i32
    %c0_i32_0 = arith.constant 0 : i32
    return %1, %c0_i32 : i32, i32
  }
  func.func @transform_2(%arg0: i32, %arg1: i32) -> (i32, i32) {
    %c1_i32 = arith.constant 1 : i32
    %0 = arith.muli %arg0, %c1_i32 : i32
    %1 = arith.addi %0, %arg1 : i32
    %c0_i32 = arith.constant 0 : i32
    %c0_i32_0 = arith.constant 0 : i32
    return %1, %c0_i32 : i32, i32
  }
  func.func @transform_3(%arg0: i32, %arg1: i32) -> (i32, i32) {
    %c0_i32 = arith.constant 0 : i32
    %c0_i32_0 = arith.constant 0 : i32
    return %arg0, %c0_i32 : i32, i32
  }
}

module attributes {stable_mosaic.version = 11 : i64} {
  func.func @_triplet_kernel(%arg0: i32, %arg1: i32, %arg2: memref<8x512xf32, #tpu.memory_space<vmem>>, %arg3: memref<8x512xf32, #tpu.memory_space<vmem>>, %arg4: memref<8x512xf32, #tpu.memory_space<vmem>>, %arg5: memref<8x128xf32, #tpu.memory_space<vmem>>, %arg6: memref<8x1xf32, #tpu.memory_space<vmem>>) attributes {dimension_semantics = [#tpu.dimension_semantics<arbitrary>, #tpu.dimension_semantics<arbitrary>], iteration_bounds = array<i64: 1, 1>, scalar_prefetch = 0 : i64, scratch_operands = 1 : i64, tpu.core_type = #tpu.core_type<tc>, window_params = [{transform_indices = @transform_0, window_bounds = array<i64: 8, 512>}, {transform_indices = @transform_1, window_bounds = array<i64: 8, 512>}, {transform_indices = @transform_2, window_bounds = array<i64: 8, 512>}, {transform_indices = @transform_3, window_bounds = array<i64: 8, 128>}]} {
    %c0_i32 = arith.constant 0 : i32
    %0 = arith.cmpi eq, %arg1, %c0_i32 : i32
    %1 = arith.extui %0 : i1 to i32
    %c0_i32_0 = arith.constant 0 : i32
    %2 = arith.cmpi ne, %1, %c0_i32_0 : i32
    scf.if %2 {
      %cst_14 = arith.constant 0.000000e+00 : f32
      %23 = vector.broadcast %cst_14 : f32 to vector<8x1xf32>
      %c0_15 = arith.constant 0 : index
      %c0_16 = arith.constant 0 : index
      %24 = vector.load %arg6[%c0_15, %c0_16] : memref<8x1xf32, #tpu.memory_space<vmem>>, vector<8x1xf32>
      tpu.vector_store %arg6[%c0_15, %c0_16], %23 {strides = array<i32>} : memref<8x1xf32, #tpu.memory_space<vmem>>, vector<8x1xf32>,
    } else {
    }
    %c0 = arith.constant 0 : index
    %c0_1 = arith.constant 0 : index
    %3 = vector.load %arg2[%c0, %c0_1] : memref<8x512xf32, #tpu.memory_space<vmem>>, vector<8x512xf32>
    %c0_2 = arith.constant 0 : index
    %c0_3 = arith.constant 0 : index
    %4 = vector.load %arg3[%c0_2, %c0_3] : memref<8x512xf32, #tpu.memory_space<vmem>>, vector<8x512xf32>
    %c0_4 = arith.constant 0 : index
    %c0_5 = arith.constant 0 : index
    %5 = vector.load %arg4[%c0_4, %c0_5] : memref<8x512xf32, #tpu.memory_space<vmem>>, vector<8x512xf32>
    %6 = arith.subf %3, %4 : vector<8x512xf32>
    %7 = arith.subf %3, %5 : vector<8x512xf32>
    %8 = arith.mulf %6, %6 : vector<8x512xf32>
    %9 = arith.mulf %7, %7 : vector<8x512xf32>
    %10 = arith.subf %8, %9 : vector<8x512xf32>
    %cst = arith.constant dense<0.000000e+00> : vector<8xf32>
    %11 = vector.multi_reduction <add>, %10, %cst [1] : vector<8x512xf32> to vector<8xf32>
    %12 = vector.shape_cast %11 : vector<8xf32> to vector<8x1xf32>
    %cst_6 = arith.constant 2.000000e+00 : f32
    %13 = vector.broadcast %cst_6 : f32 to vector<8x1xf32>
    %14 = arith.addf %12, %13 : vector<8x1xf32>
    %cst_7 = arith.constant 0.000000e+00 : f32
    %15 = vector.broadcast %cst_7 : f32 to vector<8x1xf32>
    %16 = arith.maximumf %14, %15 : vector<8x1xf32>
    %c0_8 = arith.constant 0 : index
    %c0_9 = arith.constant 0 : index
    %17 = vector.load %arg6[%c0_8, %c0_9] : memref<8x1xf32, #tpu.memory_space<vmem>>, vector<8x1xf32>
    %18 = arith.addf %17, %16 : vector<8x1xf32>
    %c0_10 = arith.constant 0 : index
    %c0_11 = arith.constant 0 : index
    %19 = vector.load %arg6[%c0_10, %c0_11] : memref<8x1xf32, #tpu.memory_space<vmem>>, vector<8x1xf32>
    tpu.vector_store %arg6[%c0_10, %c0_11], %18 {strides = array<i32>} : memref<8x1xf32, #tpu.memory_space<vmem>>, vector<8x1xf32>,
    %c0_i32_12 = arith.constant 0 : i32
    %20 = arith.cmpi eq, %arg1, %c0_i32_12 : i32
    %21 = arith.extui %20 : i1 to i32
    %c0_i32_13 = arith.constant 0 : i32
    %22 = arith.cmpi ne, %21, %c0_i32_13 : i32
    scf.if %22 {
      %c0_14 = arith.constant 0 : index
      %c0_15 = arith.constant 0 : index
      %23 = vector.load %arg6[%c0_14, %c0_15] : memref<8x1xf32, #tpu.memory_space<vmem>>, vector<8x1xf32>
      %24 = vector.shape_cast %23 : vector<8x1xf32> to vector<1x8x1xf32>
      %cst_16 = arith.constant dense<0.000000e+00> : vector<1xf32>
      %25 = vector.multi_reduction <add>, %24, %cst_16 [1, 2] : vector<1x8x1xf32> to vector<1xf32>
      %26 = vector.shape_cast %25 : vector<1xf32> to vector<1x1x1xf32>
      %27 = vector.extract %26[0, 0, 0] : f32 from vector<1x1x1xf32>
      %28 = tpu.iota {dimensions = array<i32: 0>} : vector<8x128xi32>
      %29 = tpu.iota {dimensions = array<i32: 1>} : vector<8x128xi32>
      %c0_i32_17 = arith.constant 0 : i32
      %30 = vector.broadcast %c0_i32_17 : i32 to vector<8x128xi32>
      %31 = arith.cmpi eq, %28, %30 : vector<8x128xi32>
      %c0_i32_18 = arith.constant 0 : i32
      %32 = vector.broadcast %c0_i32_18 : i32 to vector<8x128xi32>
      %33 = arith.cmpi eq, %29, %32 : vector<8x128xi32>
      %34 = arith.andi %31, %33 : vector<8x128xi1>
      %cst_19 = arith.constant 0.000000e+00 : f32
      %35 = vector.broadcast %27 : f32 to vector<8x128xf32>
      %36 = vector.broadcast %cst_19 : f32 to vector<8x128xf32>
      %37 = arith.select %34, %35, %36 : vector<8x128xi1>, vector<8x128xf32>
      %c0_20 = arith.constant 0 : index
      %c0_21 = arith.constant 0 : index
      %38 = vector.load %arg5[%c0_20, %c0_21] : memref<8x128xf32, #tpu.memory_space<vmem>>, vector<8x128xf32>
      tpu.vector_store %arg5[%c0_20, %c0_21], %37 {strides = array<i32>} : memref<8x128xf32, #tpu.memory_space<vmem>>, vector<8x128xf32>,
    } else {
    }
    return
  }
  func.func @transform_0(%arg0: i32, %arg1: i32) -> (i32, i32) {
    %c1_i32 = arith.constant 1 : i32
    %0 = arith.muli %arg0, %c1_i32 : i32
    %1 = arith.addi %0, %arg1 : i32
    %c0_i32 = arith.constant 0 : i32
    %c0_i32_0 = arith.constant 0 : i32
    return %1, %c0_i32 : i32, i32
  }
  func.func @transform_1(%arg0: i32, %arg1: i32) -> (i32, i32) {
    %c1_i32 = arith.constant 1 : i32
    %0 = arith.muli %arg0, %c1_i32 : i32
    %1 = arith.addi %0, %arg1 : i32
    %c0_i32 = arith.constant 0 : i32
    %c0_i32_0 = arith.constant 0 : i32
    return %1, %c0_i32 : i32, i32
  }
  func.func @transform_2(%arg0: i32, %arg1: i32) -> (i32, i32) {
    %c1_i32 = arith.constant 1 : i32
    %0 = arith.muli %arg0, %c1_i32 : i32
    %1 = arith.addi %0, %arg1 : i32
    %c0_i32 = arith.constant 0 : i32
    %c0_i32_0 = arith.constant 0 : i32
    return %1, %c0_i32 : i32, i32
  }
  func.func @transform_3(%arg0: i32, %arg1: i32) -> (i32, i32) {
    %c0_i32 = arith.constant 0 : i32
    %c0_i32_0 = arith.constant 0 : i32
    return %arg0, %c0_i32 : i32, i32
  }
}

</mosaic_0001>

<bundles_post_ra>
// kernel: tpu_custom_call.1
= control target key start
LH: loop header
LB: loop body
LE: loop exit
PB: predicated region body
PF: predicated region fallthrough
CT: control target
= control target key end

     0   :  { %8 = vsyncpa [#allocation4], 0  ;;  %s284_s0 = inlined_call_operand.hbm [shape: f32[8,512], index: 0, kind: input, shape index: {}]   ;;  %s285_s1 = inlined_call_operand.hbm [shape: f32[8,512], index: 1, kind: input, shape index: {}]   ;;  %s286_s2 = inlined_call_operand.hbm [shape: f32[8,512], index: 2, kind: input, shape index: {}]   ;;  %s287_s3 = inlined_call_operand.hbm [shape: f32[8,128], index: 3, kind: output, shape index: {}]  }
   0x1   :  { %9 = vsyncpa [#allocation7], 0 }
   0x2   :  { %10 = vsyncpa [#allocation5], 0  ;;  %s247_s12 = smov [#allocation6]   ;;  %s248_s14 = smov [#allocation3]  }
   0x3   :  { %s35_s13 = sshll.u32 %s247_s12, 4  ;;  %s21_s15 = sshll.u32 %s248_s14, 4  ;;  %s36_s13 = int_to_ptr.vmem [resolvable:$true] %s35_s13  ;;  %s22_s15 = int_to_ptr.vmem [resolvable:$true] %s21_s15 }
   0x4   :  { %s169_s16 = scalar_lea.vmem %s36_s13, 512  ;;  %p174_p1 = scmp.lt.s32.totalorder %s36_s13, %s36_s13 }
   0x5   :  { %p170_p0 = scmp.ne.s32.totalorder %s36_s13, %s169_s16  ;;  %p175_p2 = scmp.lt.s32.totalorder %s169_s16, %s169_s16 }
   0x7   :  { %p176_p3 = por %p175_p2, %p174_p1 }
   0x9   :  { %p177_p4 = pnand %p176_p3, %p170_p0 }
   0xb   :  { %180 = shalt.err (!%p177_p4)
}
   0xc   :  { %38 = dma.hbm_to_vmem [thread:$0]  %s285_s1, 512, %s36_s13, [#allocation7]  }
   0xd   :  { %s189_s19 = scalar_lea.vmem %s22_s15, 512  ;;  %p194_p6 = scmp.lt.s32.totalorder %s22_s15, %s22_s15 }
   0xe   :  { %p190_p5 = scmp.ne.s32.totalorder %s22_s15, %s189_s19  ;;  %p195_p7 = scmp.lt.s32.totalorder %s189_s19, %s189_s19 }
  0x10   :  { %p196_p8 = por %p195_p7, %p194_p6 }
  0x12   :  { %p197_p9 = pnand %p196_p8, %p190_p5 }
  0x14   :  { %200 = shalt.err (!%p197_p9)
}
  0x15   :  { %24 = dma.hbm_to_vmem [thread:$0]  %s284_s0, 512, %s22_s15, [#allocation4]  }
  0x16   :  { %s249_s22 = smov [#allocation8]  }
  0x17   :  { %s49_s23 = sshll.u32 %s249_s22, 4  ;;  %s50_s23 = int_to_ptr.vmem [resolvable:$true] %s49_s23 }
  0x18   :  { %s209_s24 = scalar_lea.vmem %s50_s23, 512  ;;  %p214_p11 = scmp.lt.s32.totalorder %s50_s23, %s50_s23 }
  0x19   :  { %p210_p10 = scmp.ne.s32.totalorder %s50_s23, %s209_s24  ;;  %p215_p12 = scmp.lt.s32.totalorder %s209_s24, %s209_s24 }
  0x1b   :  { %p216_p13 = por %p215_p12, %p214_p11 }
  0x1d   :  { %p217_p0 = pnand %p216_p13, %p210_p10 }
  0x1f   :  { %220 = shalt.err (!%p217_p0)
}
  0x20   :  { %52 = dma.hbm_to_vmem [thread:$0]  %s286_s2, 512, %s50_s23, [#allocation7]  }
  0x21   :  { %241 = dma.done.wait [#allocation4], 512  }
  0x22   :  { %242 = vsyncadd [#allocation4], 4294966784 }
  0x23   :  { %243 = dma.done.wait [#allocation7], 1024  }
  0x24   :  { %244 = vsyncadd [#allocation7], 4294966272  ;;  %v71_v0 = vld [vmem:[#allocation3] sm:$0xff]  ;;  %v72_v1 = vld [vmem:[#allocation3 + $0x8] sm:$0xff]  ;;  %vm69_vm0 = vcmask 7168   ;;  %v250_v35 = vmov 0.0   ;;  %v128_v50 = vlaneseq }
  0x25   :  { %v73_v2 = vld [vmem:[#allocation3 + $0x10] sm:$0xff]  ;;  %v74_v3 = vld [vmem:[#allocation3 + $0x18] sm:$0xff]  ;;  %v75_v4 = vld [vmem:[#allocation6] sm:$0xff]  ;;  %70 = vst.msk [vmem:[#allocation2] sm:$0xff] %vm69_vm0, %v250_v35  ;;  %s251_s0 = smov [#allocation9]  }
  0x26   :  { %v76_v5 = vld [vmem:[#allocation6 + $0x8] sm:$0xff]  ;;  %v77_v6 = vld [vmem:[#allocation6 + $0x10] sm:$0xff]  ;;  %v78_v7 = vld [vmem:[#allocation6 + $0x18] sm:$0xff]  ;;  %v83_v9 = vsub.f32 %v71_v0, %v75_v4  ;;  %v129_v51 = vshrl.u32 %v128_v50, 7  ;;  %v131_v52 = vand.u32 127, %v128_v50  ;;  %s144_s2 = sshll.u32 %s251_s0, 4  ;;  %s145_s2 = int_to_ptr.vmem [resolvable:$true] %s144_s2 }
  0x27   :  { %v79_v8 = vld [vmem:[#allocation8] sm:$0xff]  ;;  %v84_v10 = vsub.f32 %v72_v1, %v76_v5  ;;  %v80_v11 = vld [vmem:[#allocation8 + $0x8] sm:$0xff]  ;;  %v81_v12 = vld [vmem:[#allocation8 + $0x10] sm:$0xff]  ;;  %v85_v14 = vsub.f32 %v73_v2, %v77_v6  ;;  %v86_v15 = vsub.f32 %v74_v3, %v78_v7  ;;  %s221_s27 = scalar_lea.vmem %s145_s2, 128  ;;  %p226_p2 = scmp.lt.s32.totalorder %s145_s2, %s145_s2 }
  0x28   :  { %v82_v13 = vld [vmem:[#allocation8 + $0x18] sm:$0xff]  ;;  %v87_v16 = vsub.f32 %v71_v0, %v79_v8  ;;  %v88_v17 = vsub.f32 %v72_v1, %v80_v11  ;;  %v89_v18 = vsub.f32 %v73_v2, %v81_v12  ;;  %v91_v20 = vmul.f32 %v83_v9, %v83_v9  ;;  %p222_p1 = scmp.ne.s32.totalorder %s145_s2, %s221_s27  ;;  %p227_p3 = scmp.lt.s32.totalorder %s221_s27, %s221_s27 }
  0x29   :  { %v90_v19 = vsub.f32 %v74_v3, %v82_v13  ;;  %v92_v21 = vmul.f32 %v84_v10, %v84_v10  ;;  %v93_v22 = vmul.f32 %v85_v14, %v85_v14  ;;  %v94_v24 = vmul.f32 %v86_v15, %v86_v15 }
  0x2a   :  { %v95_v23 = vmul.f32 %v87_v16, %v87_v16  ;;  %v96_v25 = vmul.f32 %v88_v17, %v88_v17  ;;  %v97_v26 = vmul.f32 %v89_v18, %v89_v18  ;;  %vm132_vm1 = vcmp.eq.s32.totalorder %v129_v51, 0  ;;  %p228_p4 = por %p227_p3, %p226_p2 }
  0x2b   :  { %v98_v27 = vmul.f32 %v90_v19, %v90_v19  ;;  %vm133_vm2 = vcmp.eq.s32.totalorder %v131_v52, 0 }
  0x2c   :  { %v99_v28 = vsub.f32 %v91_v20, %v95_v23  ;;  %v100_v29 = vsub.f32 %v92_v21, %v96_v25  ;;  %v101_v30 = vsub.f32 %v93_v22, %v97_v26  ;;  %v110_v38 = vld [vmem:[#allocation2] sm:$0xff]  ;;  %vm134_vm3 = vmand %vm132_vm1, %vm133_vm2  ;;  %p229_p5 = pnand %p228_p4, %p222_p1 }
  0x2d   :  { %v102_v31 = vsub.f32 %v94_v24, %v98_v27 }
  0x2e   :  { %v103_v32 = vadd.f32 %v100_v29, %v99_v28 }
  0x30   :  { %v104_v33 = vadd.f32 %v103_v32, %v101_v30 }
  0x32   :  { %v105_v34 = vadd.f32 %v104_v33, %v102_v31 }
  0x34   :  { %106 = vadd.xlane.f32.xlu0 %v105_v34 }
  0xbd   :  { %v107_v36 = vpop.xlane.xlu0 %106 }
  0xbe   :  { %v108_v37 = vadd.f32 2.0, %v107_v36 }
  0xc0   :  { %v109_v39 = vmax.f32 %v108_v37, 0.0 }
  0xc2   :  { %v111_v40 = vadd.f32 %v110_v38, %v109_v39 }
  0xc4   :  { %113 = vst.msk [vmem:[#allocation2] sm:$0xff] %vm69_vm0, %v111_v40 }
  0xcb   :  { %v117_v41 = vld [vmem:[#allocation2] sm:$0xff] }
  0xcc   :  { %v118_v42 = vsel %vm69_vm0, %v117_v41, 0.0 }
  0xcd   :  { %119 = vadd.xlane.f32.xlu0 %v118_v42 }
 0x156   :  { %v120_v43 = vpop.xlane.xlu0 %119 }
 0x157   :  { %v121_v44 = vrot.slane %v120_v43, 4 }
 0x159   :  { %v122_v45 = vadd.f32 %v121_v44, %v120_v43 }
 0x15b   :  { %v123_v46 = vrot.slane %v122_v45, 2 }
 0x15d   :  { %v124_v47 = vadd.f32 %v123_v46, %v122_v45 }
 0x15f   :  { %v125_v48 = vrot.slane %v124_v47, 1 }
 0x161   :  { %v126_v49 = vadd.f32 %v125_v48, %v124_v47 }
 0x163   :  { %154 = vpush %v126_v49 }
 0x194   :  { %s155_s26 = spop %154 }
 0x195   :  { %v135_v53 = vstv %s155_s26 }
 0x196   :  { %v136_v54 = vsel %vm134_vm3, %v135_v53, 0.0 }
 0x197   :  { %137 = vst [vmem:[#allocation9] sm:$0xff] %v136_v54 }
 0x198   :  { %232 = shalt.err (!%p229_p5)
}
 0x199   :  { %147 = dma.vmem_to_hbm [thread:$0]  %s145_s2, 128, %s287_s3, [#allocation5]  }
 0x19a   :  { %245 = dma.done.wait [#allocation5], 128  }
 0x19b   :  { %246 = vsyncadd [#allocation5], 4294967168 }
 0x19c   :  { %151 = vsyncpa [#allocation4], 1 }
 0x19d   :  { %152 = vsyncpa [#allocation7], 1 }
 0x19e   :  { %153 = vsyncpa [#allocation5], 1 }

// kernel: tpu_custom_call.1
= control target key start
LH: loop header
LB: loop body
LE: loop exit
PB: predicated region body
PF: predicated region fallthrough
CT: control target
= control target key end

     0   :  { %8 = vsyncpa [#allocation4], 0  ;;  %s284_s0 = inlined_call_operand.hbm [shape: f32[8,512], index: 0, kind: input, shape index: {}]   ;;  %s285_s1 = inlined_call_operand.hbm [shape: f32[8,512], index: 1, kind: input, shape index: {}]   ;;  %s286_s2 = inlined_call_operand.hbm [shape: f32[8,512], index: 2, kind: input, shape index: {}]   ;;  %s287_s3 = inlined_call_operand.hbm [shape: f32[8,128], index: 3, kind: output, shape index: {}]  }
   0x1   :  { %9 = vsyncpa [#allocation7], 0 }
   0x2   :  { %10 = vsyncpa [#allocation5], 0  ;;  %s247_s12 = smov [#allocation6]   ;;  %s248_s14 = smov [#allocation3]  }
   0x3   :  { %s35_s13 = sshll.u32 %s247_s12, 4  ;;  %s21_s15 = sshll.u32 %s248_s14, 4  ;;  %s36_s13 = int_to_ptr.vmem [resolvable:$true] %s35_s13  ;;  %s22_s15 = int_to_ptr.vmem [resolvable:$true] %s21_s15 }
   0x4   :  { %s169_s16 = scalar_lea.vmem %s36_s13, 512  ;;  %p174_p1 = scmp.lt.s32.totalorder %s36_s13, %s36_s13 }
   0x5   :  { %p170_p0 = scmp.ne.s32.totalorder %s36_s13, %s169_s16  ;;  %p175_p2 = scmp.lt.s32.totalorder %s169_s16, %s169_s16 }
   0x7   :  { %p176_p3 = por %p175_p2, %p174_p1 }
   0x9   :  { %p177_p4 = pnand %p176_p3, %p170_p0 }
   0xb   :  { %180 = shalt.err (!%p177_p4)
}
   0xc   :  { %38 = dma.hbm_to_vmem [thread:$0]  %s285_s1, 512, %s36_s13, [#allocation7]  }
   0xd   :  { %s189_s19 = scalar_lea.vmem %s22_s15, 512  ;;  %p194_p6 = scmp.lt.s32.totalorder %s22_s15, %s22_s15 }
   0xe   :  { %p190_p5 = scmp.ne.s32.totalorder %s22_s15, %s189_s19  ;;  %p195_p7 = scmp.lt.s32.totalorder %s189_s19, %s189_s19 }
  0x10   :  { %p196_p8 = por %p195_p7, %p194_p6 }
  0x12   :  { %p197_p9 = pnand %p196_p8, %p190_p5 }
  0x14   :  { %200 = shalt.err (!%p197_p9)
}
  0x15   :  { %24 = dma.hbm_to_vmem [thread:$0]  %s284_s0, 512, %s22_s15, [#allocation4]  }
  0x16   :  { %s249_s22 = smov [#allocation8]  }
  0x17   :  { %s49_s23 = sshll.u32 %s249_s22, 4  ;;  %s50_s23 = int_to_ptr.vmem [resolvable:$true] %s49_s23 }
  0x18   :  { %s209_s24 = scalar_lea.vmem %s50_s23, 512  ;;  %p214_p11 = scmp.lt.s32.totalorder %s50_s23, %s50_s23 }
  0x19   :  { %p210_p10 = scmp.ne.s32.totalorder %s50_s23, %s209_s24  ;;  %p215_p12 = scmp.lt.s32.totalorder %s209_s24, %s209_s24 }
  0x1b   :  { %p216_p13 = por %p215_p12, %p214_p11 }
  0x1d   :  { %p217_p0 = pnand %p216_p13, %p210_p10 }
  0x1f   :  { %220 = shalt.err (!%p217_p0)
}
  0x20   :  { %52 = dma.hbm_to_vmem [thread:$0]  %s286_s2, 512, %s50_s23, [#allocation7]  }
  0x21   :  { %241 = dma.done.wait [#allocation4], 512  }
  0x22   :  { %242 = vsyncadd [#allocation4], 4294966784 }
  0x23   :  { %243 = dma.done.wait [#allocation7], 1024  }
  0x24   :  { %244 = vsyncadd [#allocation7], 4294966272  ;;  %v71_v0 = vld [vmem:[#allocation3] sm:$0xff]  ;;  %v72_v1 = vld [vmem:[#allocation3 + $0x8] sm:$0xff]  ;;  %vm69_vm0 = vcmask 7168   ;;  %v250_v35 = vmov 0.0   ;;  %v128_v50 = vlaneseq }
  0x25   :  { %v73_v2 = vld [vmem:[#allocation3 + $0x10] sm:$0xff]  ;;  %v74_v3 = vld [vmem:[#allocation3 + $0x18] sm:$0xff]  ;;  %v75_v4 = vld [vmem:[#allocation6] sm:$0xff]  ;;  %70 = vst.msk [vmem:[#allocation2] sm:$0xff] %vm69_vm0, %v250_v35  ;;  %s251_s0 = smov [#allocation9]  }
  0x26   :  { %v76_v5 = vld [vmem:[#allocation6 + $0x8] sm:$0xff]  ;;  %v77_v6 = vld [vmem:[#allocation6 + $0x10] sm:$0xff]  ;;  %v78_v7 = vld [vmem:[#allocation6 + $0x18] sm:$0xff]  ;;  %v83_v9 = vsub.f32 %v71_v0, %v75_v4  ;;  %v129_v51 = vshrl.u32 %v128_v50, 7  ;;  %v131_v52 = vand.u32 127, %v128_v50  ;;  %s144_s2 = sshll.u32 %s251_s0, 4  ;;  %s145_s2 = int_to_ptr.vmem [resolvable:$true] %s144_s2 }
  0x27   :  { %v79_v8 = vld [vmem:[#allocation8] sm:$0xff]  ;;  %v84_v10 = vsub.f32 %v72_v1, %v76_v5  ;;  %v80_v11 = vld [vmem:[#allocation8 + $0x8] sm:$0xff]  ;;  %v81_v12 = vld [vmem:[#allocation8 + $0x10] sm:$0xff]  ;;  %v85_v14 = vsub.f32 %v73_v2, %v77_v6  ;;  %v86_v15 = vsub.f32 %v74_v3, %v78_v7  ;;  %s221_s27 = scalar_lea.vmem %s145_s2, 128  ;;  %p226_p2 = scmp.lt.s32.totalorder %s145_s2, %s145_s2 }
  0x28   :  { %v82_v13 = vld [vmem:[#allocation8 + $0x18] sm:$0xff]  ;;  %v87_v16 = vsub.f32 %v71_v0, %v79_v8  ;;  %v88_v17 = vsub.f32 %v72_v1, %v80_v11  ;;  %v89_v18 = vsub.f32 %v73_v2, %v81_v12  ;;  %v91_v20 = vmul.f32 %v83_v9, %v83_v9  ;;  %p222_p1 = scmp.ne.s32.totalorder %s145_s2, %s221_s27  ;;  %p227_p3 = scmp.lt.s32.totalorder %s221_s27, %s221_s27 }
  0x29   :  { %v90_v19 = vsub.f32 %v74_v3, %v82_v13  ;;  %v92_v21 = vmul.f32 %v84_v10, %v84_v10  ;;  %v93_v22 = vmul.f32 %v85_v14, %v85_v14  ;;  %v94_v24 = vmul.f32 %v86_v15, %v86_v15 }
  0x2a   :  { %v95_v23 = vmul.f32 %v87_v16, %v87_v16  ;;  %v96_v25 = vmul.f32 %v88_v17, %v88_v17  ;;  %v97_v26 = vmul.f32 %v89_v18, %v89_v18  ;;  %vm132_vm1 = vcmp.eq.s32.totalorder %v129_v51, 0  ;;  %p228_p4 = por %p227_p3, %p226_p2 }
  0x2b   :  { %v98_v27 = vmul.f32 %v90_v19, %v90_v19  ;;  %vm133_vm2 = vcmp.eq.s32.totalorder %v131_v52, 0 }
  0x2c   :  { %v99_v28 = vsub.f32 %v91_v20, %v95_v23  ;;  %v100_v29 = vsub.f32 %v92_v21, %v96_v25  ;;  %v101_v30 = vsub.f32 %v93_v22, %v97_v26  ;;  %v110_v38 = vld [vmem:[#allocation2] sm:$0xff]  ;;  %vm134_vm3 = vmand %vm132_vm1, %vm133_vm2  ;;  %p229_p5 = pnand %p228_p4, %p222_p1 }
  0x2d   :  { %v102_v31 = vsub.f32 %v94_v24, %v98_v27 }
  0x2e   :  { %v103_v32 = vadd.f32 %v100_v29, %v99_v28 }
  0x30   :  { %v104_v33 = vadd.f32 %v103_v32, %v101_v30 }
  0x32   :  { %v105_v34 = vadd.f32 %v104_v33, %v102_v31 }
  0x34   :  { %106 = vadd.xlane.f32.xlu0 %v105_v34 }
  0xbd   :  { %v107_v36 = vpop.xlane.xlu0 %106 }
  0xbe   :  { %v108_v37 = vadd.f32 2.0, %v107_v36 }
  0xc0   :  { %v109_v39 = vmax.f32 %v108_v37, 0.0 }
  0xc2   :  { %v111_v40 = vadd.f32 %v110_v38, %v109_v39 }
  0xc4   :  { %113 = vst.msk [vmem:[#allocation2] sm:$0xff] %vm69_vm0, %v111_v40 }
  0xcb   :  { %v117_v41 = vld [vmem:[#allocation2] sm:$0xff] }
  0xcc   :  { %v118_v42 = vsel %vm69_vm0, %v117_v41, 0.0 }
  0xcd   :  { %119 = vadd.xlane.f32.xlu0 %v118_v42 }
 0x156   :  { %v120_v43 = vpop.xlane.xlu0 %119 }
 0x157   :  { %v121_v44 = vrot.slane %v120_v43, 4 }
 0x159   :  { %v122_v45 = vadd.f32 %v121_v44, %v120_v43 }
 0x15b   :  { %v123_v46 = vrot.slane %v122_v45, 2 }
 0x15d   :  { %v124_v47 = vadd.f32 %v123_v46, %v122_v45 }
 0x15f   :  { %v125_v48 = vrot.slane %v124_v47, 1 }
 0x161   :  { %v126_v49 = vadd.f32 %v125_v48, %v124_v47 }
 0x163   :  { %154 = vpush %v126_v49 }
 0x194   :  { %s155_s26 = spop %154 }
 0x195   :  { %v135_v53 = vstv %s155_s26 }
 0x196   :  { %v136_v54 = vsel %vm134_vm3, %v135_v53, 0.0 }
 0x197   :  { %137 = vst [vmem:[#allocation9] sm:$0xff] %v136_v54 }
 0x198   :  { %232 = shalt.err (!%p229_p5)
}
 0x199   :  { %147 = dma.vmem_to_hbm [thread:$0]  %s145_s2, 128, %s287_s3, [#allocation5]  }
 0x19a   :  { %245 = dma.done.wait [#allocation5], 128  }
 0x19b   :  { %246 = vsyncadd [#allocation5], 4294967168 }
 0x19c   :  { %151 = vsyncpa [#allocation4], 1 }
 0x19d   :  { %152 = vsyncpa [#allocation7], 1 }
 0x19e   :  { %153 = vsyncpa [#allocation5], 1 }

</bundles_post_ra>
